<compile_context>
chip_gen: v6e
topology: v6e:2x2x1
jax: 0.10.0
libtpu: 0.0.40
codegen_flags: <defaults>
</compile_context>

<pallas_src>
import functools
import math

import jax
import jax.numpy as jnp
from jax import lax
from jax.experimental import pallas as pl
from jax.experimental.pallas import tpu as pltpu


def _round_up(x, m):
    return ((x + m - 1) // m) * m


def _mask_attention_sampler_kernel(x_ref, et_ref, e_ref, out_ref, dist_ref, *,
                                   inv_sqrt_d):
    x = x_ref[...].astype(jnp.float32)     # (TN, D) streamed token tile
    e_t = et_ref[...].astype(jnp.float32)  # (D, K)  resident (pre-transposed)
    e = e_ref[...].astype(jnp.float32)     # (K, D)  resident
    k = e.shape[0]

    # score = X @ E^T * (1/sqrt(D)), natural (TN,D)x(D,K) form -> no per-step
    # transpose of the embedding through the XLU.
    score = jnp.dot(x, e_t, preferred_element_type=jnp.float32) * inv_sqrt_d

    # softmax: row max stays on the XLU, the row sum is offloaded to the idle MXU,
    # the reciprocal goes to the EUP slot (approx), all in f32.
    m = jnp.max(score, axis=-1, keepdims=True)
    p = jnp.exp(score - m)
    denom = jnp.dot(p, jnp.ones((k, 1), jnp.float32),
                    preferred_element_type=jnp.float32)      # (TN, 1) via MXU
    dist = p * pl.reciprocal(denom, approx=True)
    dist_ref[...] = dist.astype(dist_ref.dtype)

    # samples = one_hot(argmax(score)) with torch's first-maximal-index tie-break.
    iota = lax.broadcasted_iota(jnp.int32, score.shape, 1)
    candidates = jnp.where(score == m, iota, k)               # non-max -> sentinel k
    idx = jnp.min(candidates, axis=-1, keepdims=True)         # first argmax index
    samples = (iota == idx).astype(jnp.float32)               # (TN, K) one-hot

    # out = samples @ embedding (MXU one-hot gather, exact).
    out = jnp.dot(samples, e, preferred_element_type=jnp.float32)
    out_ref[...] = out.astype(out_ref.dtype)


def mask_attention_sampler(x, embedding, *, block_n=2048, dist_dtype=jnp.float32):
    """x: (N, dim_dic), embedding: (num_embeddings, dim_dic) -> (out, dist)."""
    n, d = x.shape
    k, d2 = embedding.shape
    assert d == d2
    n, d, k = int(n), int(d), int(k)

    d_pad = _round_up(d, 128)   # lane padding of the D axis in VMEM/vregs
    k_pad = _round_up(k, 128)   # lane padding of the K axis in VMEM/vregs

    # --- token-tile choice --------------------------------------------------
    tn = _round_up(block_n, 8)
    tn = min(tn, _round_up(max(n, 1), 8))            # never (much) bigger than N
    if n > 8:
        # keep the grid at >= 2 steps so the "parallel" axis can shard across the
        # two v7x TensorCores; no effect on 1-TC v5e/v6e.
        tn = min(tn, _round_up(pl.cdiv(n, 2), 8))
    # VMEM re-budget (v7x: 64 MiB physical). Double-buffered I/O tiles (x, out,
    # dist) plus ~8 Mosaic-materialized f32/i32 (TN, k_pad) temporaries
    # (score, p, dist, iota, candidates, samples, ...), all lane-padded.
    per_row_bytes = 2 * 4 * (2 * d_pad + k_pad) + 8 * 4 * k_pad
    vmem_budget = 40 * 1024 * 1024
    tn = max(8, min(tn, (vmem_budget // per_row_bytes) // 8 * 8))

    grid = (pl.cdiv(n, tn),)                         # partial tail block is OK:
                                                     # OOB reads padded, OOB writes dropped
    e_t = jnp.transpose(embedding)                   # (D, K), computed once

    kernel = functools.partial(
        _mask_attention_sampler_kernel, inv_sqrt_d=1.0 / math.sqrt(d))

    out, dist = pl.pallas_call(
        kernel,
        out_shape=(
            jax.ShapeDtypeStruct((n, d), jnp.float32),
            jax.ShapeDtypeStruct((n, k), dist_dtype),
        ),
        grid=grid,
        in_specs=[
            pl.BlockSpec((tn, d), lambda i: (i, 0)),   # streamed token tile
            pl.BlockSpec((d, k), lambda i: (0, 0)),    # e^T resident in VMEM
            pl.BlockSpec((k, d), lambda i: (0, 0)),    # e   resident in VMEM
        ],
        out_specs=(
            pl.BlockSpec((tn, d), lambda i: (i, 0)),
            pl.BlockSpec((tn, k), lambda i: (i, 0)),
        ),
        compiler_params=pltpu.CompilerParams(
            dimension_semantics=("parallel",),          # megacore split on v7x
            vmem_limit_bytes=48 * 1024 * 1024,          # > 40 MiB budget, < 64 MiB v7x
        ),
    )(x, e_t, embedding)

    return out, dist


def _reference(x, embedding):
    d = x.shape[-1]
    k = embedding.shape[0]
    score = x @ embedding.T / math.sqrt(d)
    dist = jax.nn.softmax(score, axis=-1)
    idx = jnp.argmax(score, axis=-1)
    samples = jax.nn.one_hot(idx, k, dtype=jnp.float32)
    out = samples @ embedding
    return out, dist


if __name__ == "__main__":
    num_embeddings = 50
    dim_dic = 32

    key = jax.random.PRNGKey(0)
    kx1, kx2, ke = jax.random.split(key, 3)

    # embedding init matches nn.init.uniform_(-1/K, 1/K)
    embedding = jax.random.uniform(
        ke, (num_embeddings, dim_dic), dtype=jnp.float32,
        minval=-1.0 / num_embeddings, maxval=1.0 / num_embeddings,
    )

    # Case 1: tiny batch (single grid step, N divides tile exactly).
    x_small = jax.random.normal(kx1, (8, dim_dic), dtype=jnp.float32)
    out, dist = mask_attention_sampler(x_small, embedding)
    jax.block_until_ready((out, dist))
    out_ref, dist_ref = _reference(x_small, embedding)
    assert out.shape == (8, dim_dic) and dist.shape == (8, num_embeddings)
    assert jnp.allclose(out, out_ref, atol=1e-5, rtol=1e-5)
    # dist tolerance loosened for the EUP approx-reciprocal softmax normalization.
    assert jnp.allclose(dist, dist_ref, atol=2e-3, rtol=2e-3)

    # Case 2: multi-step grid + ragged tail (exercises the partial-block path
    # with no wrapper pad/slice HBM round-trip).
    x_big = jax.random.normal(kx2, (300, dim_dic), dtype=jnp.float32)
    out2, dist2 = mask_attention_sampler(x_big, embedding, block_n=128)
    jax.block_until_ready((out2, dist2))
    out2_ref, dist2_ref = _reference(x_big, embedding)
    assert out2.shape == (300, dim_dic) and dist2.shape == (300, num_embeddings)
    assert jnp.allclose(out2, out2_ref, atol=1e-5, rtol=1e-5)
    assert jnp.allclose(dist2, dist2_ref, atol=2e-3, rtol=2e-3)

    # Case 3: default (large) tile path on a ragged N -> 2-step grid for v7x.
    out3, dist3 = mask_attention_sampler(x_big, embedding)
    jax.block_until_ready((out3, dist3))
    assert jnp.allclose(out3, out2_ref, atol=1e-5, rtol=1e-5)
    assert jnp.allclose(dist3, dist2_ref, atol=2e-3, rtol=2e-3)

    print("KERNEL_OK")
</pallas_src>

<mosaic_0001>
module attributes {stable_mosaic.version = 11 : i64} {
  func.func @_mask_attention_sampler_kernel(%arg0: i32, %arg1: memref<8x32xf32, #tpu.memory_space<vmem>>, %arg2: memref<32x50xf32, #tpu.memory_space<vmem>>, %arg3: memref<50x32xf32, #tpu.memory_space<vmem>>, %arg4: memref<8x32xf32, #tpu.memory_space<vmem>>, %arg5: memref<8x50xf32, #tpu.memory_space<vmem>>) attributes {dimension_semantics = [#tpu.dimension_semantics<parallel>], iteration_bounds = array<i64: 1>, scalar_prefetch = 0 : i64, scratch_operands = 0 : i64, tpu.core_type = #tpu.core_type<tc>, window_params = [{transform_indices = @transform_0, window_bounds = array<i64: 8, 32>}, {pipeline_mode = #tpu.pipeline_mode<synchronous>, transform_indices = @transform_1, window_bounds = array<i64: 32, 50>}, {pipeline_mode = #tpu.pipeline_mode<synchronous>, transform_indices = @transform_2, window_bounds = array<i64: 50, 32>}, {transform_indices = @transform_3, window_bounds = array<i64: 8, 32>}, {transform_indices = @transform_4, window_bounds = array<i64: 8, 50>}]} {
    %c0 = arith.constant 0 : index
    %c0_0 = arith.constant 0 : index
    %0 = vector.load %arg1[%c0, %c0_0] : memref<8x32xf32, #tpu.memory_space<vmem>>, vector<8x32xf32>
    %c0_1 = arith.constant 0 : index
    %c0_2 = arith.constant 0 : index
    %1 = vector.load %arg2[%c0_1, %c0_2] : memref<32x50xf32, #tpu.memory_space<vmem>>, vector<32x50xf32>
    %c0_3 = arith.constant 0 : index
    %c0_4 = arith.constant 0 : index
    %2 = vector.load %arg3[%c0_3, %c0_4] : memref<50x32xf32, #tpu.memory_space<vmem>>, vector<50x32xf32>
    %cst = arith.constant dense<0.000000e+00> : vector<8x50xf32>
    %3 = tpu.matmul %0, %1, %cst {dimension_numbers = #tpu.dot_dimension_numbers<[1], [0], [0], [1], [0, 0, 1, 1], [], []>} : vector<8x32xf32>, vector<32x50xf32>, vector<8x50xf32> -> vector<8x50xf32>
    %cst_5 = arith.constant 0.176776692 : f32
    %4 = vector.broadcast %cst_5 : f32 to vector<8x50xf32>
    %5 = arith.mulf %3, %4 : vector<8x50xf32>
    %cst_6 = arith.constant dense<0xFF800000> : vector<8xf32>
    %6 = vector.multi_reduction <maximumf>, %5, %cst_6 [1] : vector<8x50xf32> to vector<8xf32>
    %7 = vector.shape_cast %6 : vector<8xf32> to vector<8x1xf32>
    %8 = vector.broadcast %7 : vector<8x1xf32> to vector<8x50xf32>
    %9 = arith.subf %5, %8 : vector<8x50xf32>
    %10 = math.exp %9 : vector<8x50xf32>
    %cst_7 = arith.constant 1.000000e+00 : f32
    %11 = vector.broadcast %cst_7 : f32 to vector<50x1xf32>
    %cst_8 = arith.constant dense<0.000000e+00> : vector<8x1xf32>
    %12 = tpu.matmul %10, %11, %cst_8 {dimension_numbers = #tpu.dot_dimension_numbers<[1], [0], [0], [1], [0, 0, 1, 1], [], []>} : vector<8x50xf32>, vector<50x1xf32>, vector<8x1xf32> -> vector<8x1xf32>
    %13 = tpu.reciprocal %12 {approx = true} : vector<8x1xf32> -> vector<8x1xf32>
    %14 = vector.broadcast %13 : vector<8x1xf32> to vector<8x50xf32>
    %15 = arith.mulf %10, %14 : vector<8x50xf32>
    %c0_9 = arith.constant 0 : index
    %c0_10 = arith.constant 0 : index
    %16 = vector.load %arg5[%c0_9, %c0_10] : memref<8x50xf32, #tpu.memory_space<vmem>>, vector<8x50xf32>
    tpu.vector_store %arg5[%c0_9, %c0_10], %15 {strides = array<i32>} : memref<8x50xf32, #tpu.memory_space<vmem>>, vector<8x50xf32>,
    %17 = tpu.iota {dimensions = array<i32: 1>} : vector<8x50xi32>
    %18 = vector.broadcast %7 : vector<8x1xf32> to vector<8x50xf32>
    %19 = arith.cmpf oeq, %5, %18 : vector<8x50xf32>
    %c50_i32 = arith.constant 50 : i32
    %20 = vector.broadcast %c50_i32 : i32 to vector<8x50xi32>
    %21 = arith.select %19, %17, %20 : vector<8x50xi1>, vector<8x50xi32>
    %cst_11 = arith.constant dense<2147483647> : vector<8xi32>
    %22 = vector.multi_reduction <minsi>, %21, %cst_11 [1] : vector<8x50xi32> to vector<8xi32>
    %23 = vector.shape_cast %22 : vector<8xi32> to vector<8x1xi32>
    %24 = vector.broadcast %23 : vector<8x1xi32> to vector<8x50xi32>
    %25 = arith.cmpi eq, %17, %24 : vector<8x50xi32>
    %26 = arith.extui %25 : vector<8x50xi1> to vector<8x50xi32>
    %27 = arith.sitofp %26 : vector<8x50xi32> to vector<8x50xf32>
    %cst_12 = arith.constant dense<0.000000e+00> : vector<8x32xf32>
    %28 = tpu.matmul %27, %2, %cst_12 {dimension_numbers = #tpu.dot_dimension_numbers<[1], [0], [0], [1], [0, 0, 1, 1], [], []>} : vector<8x50xf32>, vector<50x32xf32>, vector<8x32xf32> -> vector<8x32xf32>
    %c0_13 = arith.constant 0 : index
    %c0_14 = arith.constant 0 : index
    %29 = vector.load %arg4[%c0_13, %c0_14] : memref<8x32xf32, #tpu.memory_space<vmem>>, vector<8x32xf32>
    tpu.vector_store %arg4[%c0_13, %c0_14], %28 {strides = array<i32>} : memref<8x32xf32, #tpu.memory_space<vmem>>, vector<8x32xf32>,
    return
  }
  func.func @transform_0(%arg0: i32) -> (i32, i32) {
    %c0_i32 = arith.constant 0 : i32
    %c0_i32_0 = arith.constant 0 : i32
    return %arg0, %c0_i32 : i32, i32
  }
  func.func @transform_1(%arg0: i32) -> (i32, i32) {
    %c0_i32 = arith.constant 0 : i32
    %c0_i32_0 = arith.constant 0 : i32
    %c0_i32_1 = arith.constant 0 : i32
    return %c0_i32, %c0_i32_0 : i32, i32
  }
  func.func @transform_2(%arg0: i32) -> (i32, i32) {
    %c0_i32 = arith.constant 0 : i32
    %c0_i32_0 = arith.constant 0 : i32
    %c0_i32_1 = arith.constant 0 : i32
    return %c0_i32, %c0_i32_0 : i32, i32
  }
  func.func @transform_3(%arg0: i32) -> (i32, i32) {
    %c0_i32 = arith.constant 0 : i32
    %c0_i32_0 = arith.constant 0 : i32
    return %arg0, %c0_i32 : i32, i32
  }
  func.func @transform_4(%arg0: i32) -> (i32, i32) {
    %c0_i32 = arith.constant 0 : i32
    %c0_i32_0 = arith.constant 0 : i32
    return %arg0, %c0_i32 : i32, i32
  }
}

</mosaic_0001>

<bundles_post_ra>
// kernel: tpu_custom_call.1
= control target key start
LH: loop header
LB: loop body
LE: loop exit
PB: predicated region body
PF: predicated region fallthrough
CT: control target
= control target key end

     0   :  { %10 = vsyncpa [#allocation3], 0  ;;  %v452_v1 = vmov 0.0   ;;  %vm453_vm0 = vmmov 0   ;;  %s559_s0 = inlined_call_operand.vmem [shape: f32[8,32], index: 0, kind: input, shape index: {}]   ;;  %s560_s1 = inlined_call_operand.vmem [shape: f32[32,50], index: 1, kind: input, shape index: {}]   ;;  %s561_s2 = inlined_call_operand.vmem [shape: f32[50,32], index: 2, kind: input, shape index: {}]   ;;  %s562_s3 = inlined_call_operand.hbm [shape: f32[8,32], index: 3, kind: output, shape index: {0}]   ;;  %s563_s4 = inlined_call_operand.hbm [shape: f32[8,50], index: 4, kind: output, shape index: {1}]  }
   0x1   :  { %v22_v0 = vld [vmem:[%s560_s1 + $0x18] sm:$0xff]  ;;  %351 = vmatprep.subr.mxu0 %v452_v1  ;;  %v21_v2 = vld [vmem:[%s560_s1 + $0x10] sm:$0xff]  ;;  %359 = vmatprep.mubr.msk.f32.mxu0 %vm453_vm0, %v452_v1 }
   0x2   :  { %11 = vsyncpa [#allocation5], 0  ;;  %352 = vmatpush3.msra.mxu0 %v22_v0  ;;  %362 = vmatprep.subr.mxu1 %v452_v1  ;;  %v20_v3 = vld [vmem:[%s560_s1 + $0x8] sm:$0xff]  ;;  %v19_v4 = vld [vmem:[%s560_s1] sm:$0xff]  ;;  %vm30_vm1 = vcmask 261120   ;;  %vm105_vm2 = vcmask 408576   ;;  %v197_v11 = vlaneseq }
   0x3   :  { %353 = vmatprep.subr.mxu0 %v452_v1  ;;  %376 = vmatprep.mubr.msk.f32.mxu1 %vm453_vm0, %v452_v1  ;;  %v18_v5 = vld [vmem:[%s559_s0] sm:$0xff]  ;;  %vm115_vm3 = vcmask 1041408   ;;  %v454_v10 = vmov 1.0   ;;  %v455_v21 = vmov 0   ;;  %v29_v22 = vld [vmem:[%s561_s2 + $0x30] sm:$0x3] }
   0x4   :  { %354 = vmatpush3.msra.mxu0 %v21_v2  ;;  %363 = vmatpush3.msk.msra.mxu1 %vm115_vm3, %v454_v10  ;;  %v198_v12 = vand.u32 127, %v197_v11  ;;  %v28_v23 = vld [vmem:[%s561_s2 + $0x28] sm:$0xff]  ;;  %v27_v24 = vld [vmem:[%s561_s2 + $0x20] sm:$0xff]  ;;  %v26_v25 = vld [vmem:[%s561_s2 + $0x18] sm:$0xff] }
   0x5   :  { %355 = vmatprep.subr.mxu0 %v452_v1  ;;  %364 = vmatprep.subr.mxu1 %v452_v1  ;;  %v25_v30 = vld [vmem:[%s561_s2 + $0x10] sm:$0xff]  ;;  %v24_v31 = vld [vmem:[%s561_s2 + $0x8] sm:$0xff]  ;;  %v23_v32 = vld [vmem:[%s561_s2] sm:$0xff]  ;;  %s456_s2 = smov [#allocation4]  }
   0x6   :  { %356 = vmatpush3.msra.mxu0 %v20_v3  ;;  %365 = vmatpush3.msra.mxu1 %v454_v10  ;;  %s312_s11 = sshll.u32 %s456_s2, 4  ;;  %s313_s11 = int_to_ptr.vmem [resolvable:$true] %s312_s11 }
   0x7   :  { %357 = vmatprep.subr.mxu0 %v452_v1  ;;  %366 = vmatprep.subr.mxu1 %v452_v1  ;;  %s408_s12 = scalar_lea.vmem %s313_s11, 128  ;;  %p413_p1 = scmp.lt.s32.totalorder %s313_s11, %s313_s11 }
   0x8   :  { %358 = vmatpush3.msra.mxu0 %v19_v4  ;;  %367 = vmatpush3.msra.mxu1 %v454_v10  ;;  %p409_p0 = scmp.ne.s32.totalorder %s313_s11, %s408_s12  ;;  %p414_p2 = scmp.lt.s32.totalorder %s408_s12, %s408_s12 }
   0x9   :  { %360 = vmatmul.mubr.msk.f32.vlgmr.msra.gmra.mxu0 %vm30_vm1, %v18_v5  ;;  %379 = vmatprep.subr.mxu0 %v452_v1 }
   0xa   :  { %393 = vmatprep.mubr.msk.f32.mxu0 %vm453_vm0, %v452_v1  ;;  %368 = vmatprep.subr.mxu1 %v452_v1  ;;  %p415_p3 = por %p414_p2, %p413_p1 }
   0xb   :  { %369 = vmatpush3.msra.mxu1 %v454_v10  ;;  %402 = vset.pattern.permute.xlu1 %v455_v21 }
   0xc   :  { %370 = vmatprep.subr.mxu1 %v452_v1  ;;  %403 = vset.pattern.permute.xlu0 %v455_v21  ;;  %p416_p4 = pnand %p415_p3, %p409_p0 }
   0xd   :  { %371 = vmatpush3.msra.mxu1 %v454_v10  ;;  %380 = vmatpush3.msk.msra.mxu0 %vm115_vm3, %v29_v22 }
   0xe   :  { %372 = vmatprep.subr.mxu1 %v452_v1  ;;  %381 = vmatprep.subr.mxu0 %v452_v1 }
   0xf   :  { %373 = vmatpush3.msra.mxu1 %v454_v10  ;;  %382 = vmatpush3.msra.mxu0 %v28_v23 }
  0x10   :  { %374 = vmatprep.subr.mxu1 %v452_v1  ;;  %383 = vmatprep.subr.mxu0 %v452_v1 }
  0x11   :  { %375 = vmatpush3.msra.mxu1 %v454_v10  ;;  %384 = vmatpush3.msra.mxu0 %v27_v24 }
  0x12   :  { %385 = vmatprep.subr.mxu0 %v452_v1 }
  0x13   :  { %386 = vmatpush3.msra.mxu0 %v26_v25 }
  0x14   :  { %387 = vmatprep.subr.mxu0 %v452_v1 }
  0x15   :  { %388 = vmatpush3.msra.mxu0 %v25_v30 }
  0x16   :  { %389 = vmatprep.subr.mxu0 %v452_v1 }
  0x17   :  { %390 = vmatpush3.msra.mxu0 %v24_v31 }
  0x18   :  { %391 = vmatprep.subr.mxu0 %v452_v1 }
  0x19   :  { %392 = vmatpush3.msra.mxu0 %v23_v32 }
  0xc9   :  { %v100_v6 = vpop.f32.mrf.mxu0 }
  0xca   :  { %v104_v7 = vmul.f32 0.17677669, %v100_v6 }
  0xcb   :  { %v361_v8 = vpop.f32.mrf.mxu0 }
  0xcc   :  { %v106_v9 = vsel %vm105_vm2, %v104_v7, -inf }
  0xcd   :  { %107 = vmax.xlane.f32.xlu0 %v106_v9 }
 0x156   :  { %v108_v13 = vpop.xlane.xlu0 %107 }
 0x157   :  { %v109_v14 = vsub.f32 %v104_v7, %v108_v13  ;;  %vm199_vm4 = vcmp.eq.f32.partialorder %v104_v7, %v108_v13 }
 0x158   :  { %v200_v15 = vsel %vm199_vm4, %v198_v12, 50 }
 0x159   :  { %v110_v16 = vmul.f32 1.442695, %v109_v14  ;;  %v201_v17 = vsel %vm105_vm2, %v200_v15, 2147483647 }
 0x15a   :  { %v203_v18 = vshra.s32 %v201_v17, 16  ;;  %v202_v26 = vand.u32 65535, %v201_v17 }
 0x15b   :  { %404 = vpow2.f32 %v110_v16 }
 0x15c   :  { %v205_v19 = vcvt.s32.f32 %v203_v18  ;;  %v204_v28 = vcvt.s32.f32 %v202_v26 }
 0x15e   :  { %206 = vmin.xlane.f32.xlu0 %v205_v19 }
 0x168   :  { %v405_v20 = vpop.eup %404 }
 0x169   :  { %377 = vmatmul.mubr.msk.f32.vlgmr.msra.gmra.mxu1 %vm105_vm2, %v405_v20 }
 0x1e7   :  { %v207_v27 = vpop.xlane.xlu0 %206 }
 0x1e8   :  { %vm208_vm5 = vcmp.eq.f32.partialorder %v205_v19, %v207_v27  ;;  %v213_v36 = vcvt.f32.s32 %v207_v27 }
 0x1e9   :  { %v209_v29 = vsel %vm208_vm5, %v204_v28, inf }
 0x1ea   :  { %210 = vmin.xlane.f32.xlu1 %v209_v29  ;;  %v214_v38 = vshll.u32 %v213_v36, 16 }
 0x229   :  { %v185_v33 = vpop.f32.mrf.mxu1 }
 0x22a   :  { %406 = vrcp.f32 %v185_v33 }
 0x22b   :  { %v378_v34 = vpop.f32.mrf.mxu1 }
 0x237   :  { %v407_v35 = vpop.eup %406 }
 0x238   :  { %192 = vperm.xlu1 %402, %v407_v35  }
 0x273   :  { %v211_v37 = vpop.xlane.xlu1 %210 }
 0x274   :  { %v212_v39 = vcvt.f32.s32 %v211_v37 }
 0x276   :  { %v215_v40 = vadd.s32 %v214_v38, %v212_v39 }
 0x278   :  { %vm216_vm6 = vcmp.eq.s32.totalorder %v198_v12, %v215_v40 }
 0x279   :  { %v327_v41 = vsel %vm216_vm6, 1.0, %v452_v1 }
 0x27a   :  { %394 = vmatmul.mubr.msk.f32.vlgmr.msra.gmra.mxu0 %vm105_vm2, %v327_v41 }
 0x2b3   :  { %v193_v42 = vpop.permute.xlu1 %192 }
 0x2b4   :  { %v195_v43 = vmul.f32 %v405_v20, %v193_v42 }
 0x2b6   :  { %196 = vst.msk [vmem:[#allocation4] sm:$0xff] %vm105_vm2, %v195_v43 }
 0x2b7   :  { %419 = shalt.err (!%p416_p4)
}
 0x2b8   :  { %315 = dma.vmem_to_hbm [thread:$0]  %s313_s11, 128, %s563_s4, [#allocation5]  }
 0x2b9   :  { %s457_s15 = smov [#allocation2]  }
 0x2ba   :  { %s302_s16 = sshll.u32 %s457_s15, 4  ;;  %s303_s16 = int_to_ptr.vmem [resolvable:$true] %s302_s16 }
 0x2bb   :  { %s428_s17 = scalar_lea.vmem %s303_s16, 128  ;;  %p433_p6 = scmp.lt.s32.totalorder %s303_s16, %s303_s16 }
 0x2bc   :  { %p429_p5 = scmp.ne.s32.totalorder %s303_s16, %s428_s17  ;;  %p434_p7 = scmp.lt.s32.totalorder %s428_s17, %s428_s17 }
 0x2be   :  { %p435_p8 = por %p434_p7, %p433_p6 }
 0x2c0   :  { %p436_p9 = pnand %p435_p8, %p429_p5 }
 0x33a   :  { %v291_v44 = vpop.f32.mrf.mxu0 }
 0x33b   :  { %295 = vst.msk [vmem:[#allocation2] sm:$0xff] %vm30_vm1, %v291_v44 }
 0x33c   :  { %v395_v45 = vpop.f32.mrf.mxu0 }
 0x33d   :  { %439 = shalt.err (!%p436_p9)
}
 0x33e   :  { %305 = dma.vmem_to_hbm [thread:$0]  %s303_s16, 128, %s562_s3, [#allocation3]  }
 0x33f   :  { %448 = dma.done.wait [#allocation3], 128  }
 0x340   :  { %449 = vsyncadd [#allocation3], 4294967168 }
 0x341   :  { %450 = dma.done.wait [#allocation5], 128  }
 0x342   :  { %451 = vsyncadd [#allocation5], 4294967168 }
 0x343   :  { %322 = vsyncpa [#allocation3], 1 }
 0x344   :  { %323 = vsyncpa [#allocation5], 1 }

</bundles_post_ra>
